<compile_context>
chip_gen: v6e
topology: v6e:2x2x1
jax: 0.10.0
libtpu: 0.0.40
codegen_flags: <defaults>
</compile_context>

<pallas_src>
import math
from functools import partial

import jax
import jax.numpy as jnp
from jax import lax
from jax.experimental import pallas as pl
from jax.experimental.pallas import tpu as pltpu

_MIB = 1024 * 1024


# ----------------------------------------------------------------------------
# Tiling / VMEM helpers
# ----------------------------------------------------------------------------
def _physical_vmem_bytes():
    """Per-core VMEM capacity; falls back to the v7x minimum (64 MiB)."""
    try:
        return int(pltpu.get_tpu_info().vmem_capacity_bytes)
    except Exception:
        return 64 * _MIB


def _clamp_vmem_limit(need_bytes, phys_bytes):
    """Scoped-VMEM limit = actual need + headroom, capped at ~90% of physical."""
    return int(min(max(need_bytes + 8 * _MIB, 32 * _MIB), int(phys_bytes * 0.9)))


def _pick_row_tile(m, cap):
    """Largest divisor of m that is <= cap and sublane friendly (mult of 8 or == m)."""
    cap = max(1, min(cap, m))
    for t in range(cap, 0, -1):
        if m % t == 0 and (t % 8 == 0 or t == m):
            return t
    return m


def _pick_head_block(num_heads, head_dim):
    """Heads per attention grid step: smallest divisor of num_heads whose column
    width (hb * head_dim) is a multiple of 128 lanes; else all heads (full H)."""
    for hb in range(1, num_heads + 1):
        if num_heads % hb == 0 and (hb * head_dim) % 128 == 0:
            return hb
    return num_heads


# ----------------------------------------------------------------------------
# Parameter fusion (do ONCE at setup, not per forward call)
# ----------------------------------------------------------------------------
def fuse_qkv_params(Wq, bq, Wk, bk, Wv, bv, num_heads, dtype):
    """Fused [H, 3H] weight and [1, 3H] (f32) bias; 1/sqrt(head_dim) folded into Q."""
    H = Wq.shape[0]
    dh = H // num_heads
    scale = 1.0 / math.sqrt(dh)
    w = jnp.concatenate([Wq.T * scale, Wk.T, Wv.T], axis=1).astype(dtype)      # [H, 3H]
    b = jnp.concatenate([bq * scale, bk, bv]).reshape(1, 3 * H).astype(jnp.float32)
    return w, b


# ----------------------------------------------------------------------------
# Kernels
# ----------------------------------------------------------------------------
def _qkv_proj_kernel(x_ref, w_ref, b_ref, q_ref, k_ref, v_ref, *, hidden):
    # x: (tm, H)  w: (H, 3H)  b: (1, 3H) f32  outs: (tm, H) each.
    acc = jnp.dot(x_ref[...], w_ref[...], preferred_element_type=jnp.float32)
    acc = acc + b_ref[...]          # bias stays f32 on purpose: added in the f32 acc
    q_ref[...] = acc[:, :hidden].astype(q_ref.dtype)
    k_ref[...] = acc[:, hidden:2 * hidden].astype(k_ref.dtype)
    v_ref[...] = acc[:, 2 * hidden:].astype(v_ref.dtype)


def _attention_kernel(q_ref, k_ref, v_ref, mask_ref, o_ref, *, heads_per_block,
                      head_dim):
    # q/k/v/o refs: (S, heads_per_block * head_dim) for one batch & head-block.
    # mask: (1, S) additive, broadcast over query rows.
    mask = mask_ref[...].astype(jnp.float32)
    for h in range(heads_per_block):            # static unrolled loop: back-to-back MXU
        lo = h * head_dim
        hi = lo + head_dim
        q = q_ref[:, lo:hi]                     # (S, dh); 1/sqrt(dh) already folded in
        k = k_ref[:, lo:hi]
        v = v_ref[:, lo:hi]
        # scores = q @ k^T in the input dtype (bf16-native MXU), f32 accumulation.
        scores = lax.dot_general(q, k, (((1,), (1,)), ((), ())),
                                 preferred_element_type=jnp.float32)
        scores = scores + mask
        m = jnp.max(scores, axis=-1, keepdims=True)
        p = jnp.exp(scores - m)
        denom = jnp.sum(p, axis=-1, keepdims=True)
        # Deferred softmax normalisation: probs @ V first, then scale S*dh rows.
        ctx = jnp.dot(p.astype(v.dtype), v, preferred_element_type=jnp.float32)
        # TODO(synk): attention-prob dropout omitted (eval-mode identity); training
        # would need pltpu.prng_seed + pltpu.stateful_bernoulli on `p`.
        inv = pl.reciprocal(denom, approx=False)  # approx=True if looser tol is OK
        o_ref[:, lo:hi] = (ctx * inv).astype(o_ref.dtype)


# ----------------------------------------------------------------------------
# pallas_call wrappers
# ----------------------------------------------------------------------------
def _qkv_projection(x2d, w_qkv, b_qkv, tm, vmem_limit, single_buffer_weights):
    M, H = x2d.shape
    dtype = x2d.dtype
    extra = dict(pipeline_mode=pl.Buffered(1)) if single_buffer_weights else {}
    w_spec = pl.BlockSpec((H, 3 * H), lambda i: (0, 0), **extra)   # VMEM-resident slab
    b_spec = pl.BlockSpec((1, 3 * H), lambda i: (0, 0), **extra)
    out_spec = pl.BlockSpec((tm, H), lambda i: (i, 0))
    cost = pl.CostEstimate(
        flops=2 * M * H * 3 * H,
        transcendentals=0,
        bytes_accessed=(M * H + H * 3 * H + 3 * M * H) * dtype.itemsize + 3 * H * 4,
    )
    return pl.pallas_call(
        partial(_qkv_proj_kernel, hidden=H),
        out_shape=tuple(jax.ShapeDtypeStruct((M, H), dtype) for _ in range(3)),
        grid_spec=pltpu.PrefetchScalarGridSpec(
            num_scalar_prefetch=0,
            grid=(M // tm,),
            in_specs=[
                pl.BlockSpec((tm, H), lambda i: (i, 0)),   # token tile (pipelined)
                w_spec,
                b_spec,
            ],
            out_specs=[out_spec, out_spec, out_spec],
        ),
        compiler_params=pltpu.CompilerParams(
            dimension_semantics=("parallel",),
            vmem_limit_bytes=vmem_limit,
        ),
        cost_estimate=cost,
    )(x2d, w_qkv, b_qkv)


def _attention(q, k, v, mask3d, heads_per_block, head_dim, vmem_limit):
    B, S, H = q.shape
    dtype = q.dtype
    blk_w = heads_per_block * head_dim
    num_heads = H // head_dim
    qkv_spec = pl.BlockSpec((None, S, blk_w), lambda b, h: (b, 0, h))
    cost = pl.CostEstimate(
        flops=4 * B * num_heads * S * S * head_dim,
        transcendentals=B * num_heads * S * S,
        bytes_accessed=4 * B * S * H * dtype.itemsize + B * S * 4,
    )
    return pl.pallas_call(
        partial(_attention_kernel, heads_per_block=heads_per_block,
                head_dim=head_dim),
        out_shape=jax.ShapeDtypeStruct((B, S, H), dtype),
        grid_spec=pltpu.PrefetchScalarGridSpec(
            num_scalar_prefetch=0,
            grid=(B, num_heads // heads_per_block),
            in_specs=[
                qkv_spec,                                            # q
                qkv_spec,                                            # k
                qkv_spec,                                            # v
                pl.BlockSpec((None, 1, S), lambda b, h: (b, 0, 0)),  # additive mask
            ],
            out_specs=pl.BlockSpec((None, S, blk_w), lambda b, h: (b, 0, h)),
        ),
        compiler_params=pltpu.CompilerParams(
            dimension_semantics=("parallel", "parallel"),
            vmem_limit_bytes=vmem_limit,
        ),
        cost_estimate=cost,
    )(q, k, v, mask3d)


# ----------------------------------------------------------------------------
# Forward pass
# ----------------------------------------------------------------------------
def bert_self_attention(hidden_states, attention_mask, w_qkv, b_qkv, num_heads):
    """hidden_states: [B,S,H]; attention_mask: additive [B,1,1,S];
    w_qkv/b_qkv: pre-fused params from fuse_qkv_params (scale folded into Q)."""
    B, S, H = hidden_states.shape
    assert H % num_heads == 0
    dh = H // num_heads
    M = B * S
    dtype = hidden_states.dtype
    itemsize = jnp.dtype(dtype).itemsize

    phys_vmem = _physical_vmem_bytes()

    # Generation-conditional token tile: v5e/v6e (128 MiB VMEM) take bigger tiles,
    # v7x (64 MiB per TC) keeps the 512 cap plus the single-buffered weight slab.
    if phys_vmem >= 100 * _MIB:
        row_cap = 2048 if itemsize <= 2 else 1024
    else:
        row_cap = 512
    tm = _pick_row_tile(M, row_cap)

    def proj_need(t, single_w):
        buf = 1 if single_w else 2
        return ((2 * t * H + buf * (H * 3 * H) + 2 * 3 * t * H) * itemsize
                + buf * 3 * H * 4            # f32 bias
                + t * 3 * H * 4)             # f32 accumulator

    while proj_need(tm, True) > int(0.7 * phys_vmem):
        new_tm = _pick_row_tile(M, tm // 2)
        if new_tm >= tm:
            break
        tm = new_tm

    # ---- fused QKV projection: one (M,H) x (H,3H) GEMM, 3 lane-dense outputs ----
    x2d = hidden_states.reshape(M, H)
    try:
        q2d, k2d, v2d = _qkv_projection(
            x2d, w_qkv, b_qkv, tm,
            _clamp_vmem_limit(proj_need(tm, True), phys_vmem),
            single_buffer_weights=True)
    except Exception:
        # pl.Buffered(1) not supported on this jax build: fall back to default
        # double buffering of the constant-index weight slab.
        q2d, k2d, v2d = _qkv_projection(
            x2d, w_qkv, b_qkv, tm,
            _clamp_vmem_limit(proj_need(tm, False), phys_vmem),
            single_buffer_weights=False)

    # Contiguous (free) reshapes only; no XLA transposes anywhere.
    q = q2d.reshape(B, S, H)
    k = k2d.reshape(B, S, H)
    v = v2d.reshape(B, S, H)
    mask3d = jnp.asarray(attention_mask, jnp.float32).reshape(B, 1, S)

    # ---- fused attention over (batch, head-block) -------------------------------
    hb = _pick_head_block(num_heads, dh)
    blk_w = hb * dh
    attn_need = (2 * 4 * S * blk_w * itemsize    # q, k, v, out blocks (double-buffered)
                 + 2 * S * 4                     # mask
                 + 3 * S * S * 4)                # scores / exp temps (f32)
    ctx = _attention(q, k, v, mask3d, hb, dh,
                     _clamp_vmem_limit(attn_need, phys_vmem))
    return ctx   # already [B, S, H]: heads were written into their column blocks


# ----------------------------------------------------------------------------
# Reference & test
# ----------------------------------------------------------------------------
def _reference(x, mask, Wq, bq, Wk, bk, Wv, bv, nh):
    B, S, H = x.shape
    dh = H // nh

    def proj(W, b):
        t = x.reshape(-1, H) @ W.T + b
        return t.reshape(B, S, nh, dh).transpose(0, 2, 1, 3)

    q, k, v = proj(Wq, bq), proj(Wk, bk), proj(Wv, bv)
    scores = jnp.einsum("bhqd,bhkd->bhqk", q, k) / math.sqrt(dh)
    scores = scores + mask                       # mask: [B,1,1,S] additive
    probs = jax.nn.softmax(scores, axis=-1)
    ctx = jnp.einsum("bhqk,bhkd->bhqd", probs, v)
    return ctx.transpose(0, 2, 1, 3).reshape(B, S, H)


if __name__ == "__main__":
    batch, seq, hidden, num_heads = 2, 8, 32, 4

    key = jax.random.PRNGKey(0)
    ks = jax.random.split(key, 7)
    x = jax.random.normal(ks[0], (batch, seq, hidden), dtype=jnp.float32)
    Wq = jax.random.normal(ks[1], (hidden, hidden), dtype=jnp.float32) * 0.05
    Wk = jax.random.normal(ks[2], (hidden, hidden), dtype=jnp.float32) * 0.05
    Wv = jax.random.normal(ks[3], (hidden, hidden), dtype=jnp.float32) * 0.05
    bq = jax.random.normal(ks[4], (hidden,), dtype=jnp.float32) * 0.05
    bk = jax.random.normal(ks[5], (hidden,), dtype=jnp.float32) * 0.05
    bv = jax.random.normal(ks[6], (hidden,), dtype=jnp.float32) * 0.05

    # BERT-style additive mask [B,1,1,S]: 0 for kept tokens, -1e4 for padding.
    lengths = jnp.array([seq, seq - 3])
    keep = jnp.arange(seq)[None, :] < lengths[:, None]
    attention_mask = jnp.where(keep, 0.0, -1e4).astype(jnp.float32)
    attention_mask = attention_mask.reshape(batch, 1, 1, seq)

    # Fuse projection params ONCE (hoisted out of the hot path).
    w_qkv, b_qkv = fuse_qkv_params(Wq, bq, Wk, bk, Wv, bv, num_heads, x.dtype)

    y = bert_self_attention(x, attention_mask, w_qkv, b_qkv, num_heads)
    y = jax.block_until_ready(y)

    ref = _reference(x, attention_mask, Wq, bq, Wk, bk, Wv, bv, num_heads)
    assert y.shape == (batch, seq, hidden)
    assert jnp.allclose(y, ref, atol=1e-4, rtol=1e-4), float(jnp.max(jnp.abs(y - ref)))

    print("KERNEL_OK")
</pallas_src>

<mosaic_0001>
module attributes {stable_mosaic.version = 11 : i64} {
  func.func @_qkv_proj_kernel(%arg0: i32, %arg1: memref<16x32xf32, #tpu.memory_space<vmem>>, %arg2: memref<32x96xf32, #tpu.memory_space<vmem>>, %arg3: memref<1x96xf32, #tpu.memory_space<vmem>>, %arg4: memref<16x32xf32, #tpu.memory_space<vmem>>, %arg5: memref<16x32xf32, #tpu.memory_space<vmem>>, %arg6: memref<16x32xf32, #tpu.memory_space<vmem>>) attributes {dimension_semantics = [#tpu.dimension_semantics<parallel>], iteration_bounds = array<i64: 1>, scalar_prefetch = 0 : i64, scratch_operands = 0 : i64, tpu.core_type = #tpu.core_type<tc>, window_params = [{transform_indices = @transform_0, window_bounds = array<i64: 16, 32>}, {pipeline_mode = #tpu.pipeline_mode<synchronous>, transform_indices = @transform_1, window_bounds = array<i64: 32, 96>}, {pipeline_mode = #tpu.pipeline_mode<synchronous>, transform_indices = @transform_2, window_bounds = array<i64: 1, 96>}, {transform_indices = @transform_3, window_bounds = array<i64: 16, 32>}, {transform_indices = @transform_4, window_bounds = array<i64: 16, 32>}, {transform_indices = @transform_5, window_bounds = array<i64: 16, 32>}]} {
    %c0 = arith.constant 0 : index
    %c0_0 = arith.constant 0 : index
    %0 = vector.load %arg1[%c0, %c0_0] : memref<16x32xf32, #tpu.memory_space<vmem>>, vector<16x32xf32>
    %c0_1 = arith.constant 0 : index
    %c0_2 = arith.constant 0 : index
    %1 = vector.load %arg2[%c0_1, %c0_2] : memref<32x96xf32, #tpu.memory_space<vmem>>, vector<32x96xf32>
    %cst = arith.constant dense<0.000000e+00> : vector<16x96xf32>
    %2 = tpu.matmul %0, %1, %cst {dimension_numbers = #tpu.dot_dimension_numbers<[1], [0], [0], [1], [0, 0, 1, 1], [], []>} : vector<16x32xf32>, vector<32x96xf32>, vector<16x96xf32> -> vector<16x96xf32>
    %c0_3 = arith.constant 0 : index
    %c0_4 = arith.constant 0 : index
    %3 = vector.load %arg3[%c0_3, %c0_4] : memref<1x96xf32, #tpu.memory_space<vmem>>, vector<1x96xf32>
    %4 = vector.broadcast %3 : vector<1x96xf32> to vector<16x96xf32>
    %5 = arith.addf %2, %4 : vector<16x96xf32>
    %6 = vector.extract_strided_slice %5 {offsets = [0, 0], sizes = [16, 32], strides = [1, 1]} : vector<16x96xf32> to vector<16x32xf32>
    %c0_5 = arith.constant 0 : index
    %c0_6 = arith.constant 0 : index
    %7 = vector.load %arg4[%c0_5, %c0_6] : memref<16x32xf32, #tpu.memory_space<vmem>>, vector<16x32xf32>
    tpu.vector_store %arg4[%c0_5, %c0_6], %6 {strides = array<i32>} : memref<16x32xf32, #tpu.memory_space<vmem>>, vector<16x32xf32>,
    %8 = vector.extract_strided_slice %5 {offsets = [0, 32], sizes = [16, 32], strides = [1, 1]} : vector<16x96xf32> to vector<16x32xf32>
    %c0_7 = arith.constant 0 : index
    %c0_8 = arith.constant 0 : index
    %9 = vector.load %arg5[%c0_7, %c0_8] : memref<16x32xf32, #tpu.memory_space<vmem>>, vector<16x32xf32>
    tpu.vector_store %arg5[%c0_7, %c0_8], %8 {strides = array<i32>} : memref<16x32xf32, #tpu.memory_space<vmem>>, vector<16x32xf32>,
    %10 = vector.extract_strided_slice %5 {offsets = [0, 64], sizes = [16, 32], strides = [1, 1]} : vector<16x96xf32> to vector<16x32xf32>
    %c0_9 = arith.constant 0 : index
    %c0_10 = arith.constant 0 : index
    %11 = vector.load %arg6[%c0_9, %c0_10] : memref<16x32xf32, #tpu.memory_space<vmem>>, vector<16x32xf32>
    tpu.vector_store %arg6[%c0_9, %c0_10], %10 {strides = array<i32>} : memref<16x32xf32, #tpu.memory_space<vmem>>, vector<16x32xf32>,
    return
  }
  func.func @transform_0(%arg0: i32) -> (i32, i32) {
    %c0_i32 = arith.constant 0 : i32
    %c0_i32_0 = arith.constant 0 : i32
    return %arg0, %c0_i32 : i32, i32
  }
  func.func @transform_1(%arg0: i32) -> (i32, i32) {
    %c0_i32 = arith.constant 0 : i32
    %c0_i32_0 = arith.constant 0 : i32
    %c0_i32_1 = arith.constant 0 : i32
    return %c0_i32, %c0_i32_0 : i32, i32
  }
  func.func @transform_2(%arg0: i32) -> (i32, i32) {
    %c0_i32 = arith.constant 0 : i32
    %c0_i32_0 = arith.constant 0 : i32
    %c0_i32_1 = arith.constant 0 : i32
    return %c0_i32, %c0_i32_0 : i32, i32
  }
  func.func @transform_3(%arg0: i32) -> (i32, i32) {
    %c0_i32 = arith.constant 0 : i32
    %c0_i32_0 = arith.constant 0 : i32
    return %arg0, %c0_i32 : i32, i32
  }
  func.func @transform_4(%arg0: i32) -> (i32, i32) {
    %c0_i32 = arith.constant 0 : i32
    %c0_i32_0 = arith.constant 0 : i32
    return %arg0, %c0_i32 : i32, i32
  }
  func.func @transform_5(%arg0: i32) -> (i32, i32) {
    %c0_i32 = arith.constant 0 : i32
    %c0_i32_0 = arith.constant 0 : i32
    return %arg0, %c0_i32 : i32, i32
  }
}

module attributes {stable_mosaic.version = 11 : i64} {
  func.func @_qkv_proj_kernel(%arg0: i32, %arg1: memref<16x32xf32, #tpu.memory_space<vmem>>, %arg2: memref<32x96xf32, #tpu.memory_space<vmem>>, %arg3: memref<1x96xf32, #tpu.memory_space<vmem>>, %arg4: memref<16x32xf32, #tpu.memory_space<vmem>>, %arg5: memref<16x32xf32, #tpu.memory_space<vmem>>, %arg6: memref<16x32xf32, #tpu.memory_space<vmem>>) attributes {dimension_semantics = [#tpu.dimension_semantics<parallel>], iteration_bounds = array<i64: 1>, scalar_prefetch = 0 : i64, scratch_operands = 0 : i64, tpu.core_type = #tpu.core_type<tc>, window_params = [{transform_indices = @transform_0, window_bounds = array<i64: 16, 32>}, {pipeline_mode = #tpu.pipeline_mode<synchronous>, transform_indices = @transform_1, window_bounds = array<i64: 32, 96>}, {pipeline_mode = #tpu.pipeline_mode<synchronous>, transform_indices = @transform_2, window_bounds = array<i64: 1, 96>}, {transform_indices = @transform_3, window_bounds = array<i64: 16, 32>}, {transform_indices = @transform_4, window_bounds = array<i64: 16, 32>}, {transform_indices = @transform_5, window_bounds = array<i64: 16, 32>}]} {
    %c0 = arith.constant 0 : index
    %c0_0 = arith.constant 0 : index
    %0 = vector.load %arg1[%c0, %c0_0] : memref<16x32xf32, #tpu.memory_space<vmem>>, vector<16x32xf32>
    %c0_1 = arith.constant 0 : index
    %c0_2 = arith.constant 0 : index
    %1 = vector.load %arg2[%c0_1, %c0_2] : memref<32x96xf32, #tpu.memory_space<vmem>>, vector<32x96xf32>
    %cst = arith.constant dense<0.000000e+00> : vector<16x96xf32>
    %2 = tpu.matmul %0, %1, %cst {dimension_numbers = #tpu.dot_dimension_numbers<[1], [0], [0], [1], [0, 0, 1, 1], [], []>} : vector<16x32xf32>, vector<32x96xf32>, vector<16x96xf32> -> vector<16x96xf32>
    %c0_3 = arith.constant 0 : index
    %c0_4 = arith.constant 0 : index
    %3 = vector.load %arg3[%c0_3, %c0_4] : memref<1x96xf32, #tpu.memory_space<vmem>>, vector<1x96xf32>
    %4 = vector.broadcast %3 : vector<1x96xf32> to vector<16x96xf32>
    %5 = arith.addf %2, %4 : vector<16x96xf32>
    %6 = vector.extract_strided_slice %5 {offsets = [0, 0], sizes = [16, 32], strides = [1, 1]} : vector<16x96xf32> to vector<16x32xf32>
    %c0_5 = arith.constant 0 : index
    %c0_6 = arith.constant 0 : index
    %7 = vector.load %arg4[%c0_5, %c0_6] : memref<16x32xf32, #tpu.memory_space<vmem>>, vector<16x32xf32>
    tpu.vector_store %arg4[%c0_5, %c0_6], %6 {strides = array<i32>} : memref<16x32xf32, #tpu.memory_space<vmem>>, vector<16x32xf32>,
    %8 = vector.extract_strided_slice %5 {offsets = [0, 32], sizes = [16, 32], strides = [1, 1]} : vector<16x96xf32> to vector<16x32xf32>
    %c0_7 = arith.constant 0 : index
    %c0_8 = arith.constant 0 : index
    %9 = vector.load %arg5[%c0_7, %c0_8] : memref<16x32xf32, #tpu.memory_space<vmem>>, vector<16x32xf32>
    tpu.vector_store %arg5[%c0_7, %c0_8], %8 {strides = array<i32>} : memref<16x32xf32, #tpu.memory_space<vmem>>, vector<16x32xf32>,
    %10 = vector.extract_strided_slice %5 {offsets = [0, 64], sizes = [16, 32], strides = [1, 1]} : vector<16x96xf32> to vector<16x32xf32>
    %c0_9 = arith.constant 0 : index
    %c0_10 = arith.constant 0 : index
    %11 = vector.load %arg6[%c0_9, %c0_10] : memref<16x32xf32, #tpu.memory_space<vmem>>, vector<16x32xf32>
    tpu.vector_store %arg6[%c0_9, %c0_10], %10 {strides = array<i32>} : memref<16x32xf32, #tpu.memory_space<vmem>>, vector<16x32xf32>,
    return
  }
  func.func @transform_0(%arg0: i32) -> (i32, i32) {
    %c0_i32 = arith.constant 0 : i32
    %c0_i32_0 = arith.constant 0 : i32
    return %arg0, %c0_i32 : i32, i32
  }
  func.func @transform_1(%arg0: i32) -> (i32, i32) {
    %c0_i32 = arith.constant 0 : i32
    %c0_i32_0 = arith.constant 0 : i32
    %c0_i32_1 = arith.constant 0 : i32
    return %c0_i32, %c0_i32_0 : i32, i32
  }
  func.func @transform_2(%arg0: i32) -> (i32, i32) {
    %c0_i32 = arith.constant 0 : i32
    %c0_i32_0 = arith.constant 0 : i32
    %c0_i32_1 = arith.constant 0 : i32
    return %c0_i32, %c0_i32_0 : i32, i32
  }
  func.func @transform_3(%arg0: i32) -> (i32, i32) {
    %c0_i32 = arith.constant 0 : i32
    %c0_i32_0 = arith.constant 0 : i32
    return %arg0, %c0_i32 : i32, i32
  }
  func.func @transform_4(%arg0: i32) -> (i32, i32) {
    %c0_i32 = arith.constant 0 : i32
    %c0_i32_0 = arith.constant 0 : i32
    return %arg0, %c0_i32 : i32, i32
  }
  func.func @transform_5(%arg0: i32) -> (i32, i32) {
    %c0_i32 = arith.constant 0 : i32
    %c0_i32_0 = arith.constant 0 : i32
    return %arg0, %c0_i32 : i32, i32
  }
}

</mosaic_0001>

<bundles_post_ra>
// kernel: tpu_custom_call.1
= control target key start
LH: loop header
LB: loop body
LE: loop exit
PB: predicated region body
PF: predicated region fallthrough
CT: control target
= control target key end

     0   :  { %11 = vsyncpa [#allocation3], 0  ;;  %s428_s0 = inlined_call_operand.hbm [shape: f32[16,32], index: 0, kind: input, shape index: {}]   ;;  %s429_s1 = inlined_call_operand.hbm [shape: f32[32,96], index: 1, kind: input, shape index: {}]   ;;  %s430_s2 = inlined_call_operand.vmem [shape: f32[1,96], index: 2, kind: input, shape index: {}]   ;;  %s431_s3 = inlined_call_operand.hbm [shape: f32[16,32], index: 3, kind: output, shape index: {0}]   ;;  %s432_s4 = inlined_call_operand.hbm [shape: f32[16,32], index: 4, kind: output, shape index: {1}]   ;;  %s433_s5 = inlined_call_operand.hbm [shape: f32[16,32], index: 5, kind: output, shape index: {2}]  }
   0x1   :  { %12 = vsyncpa [#allocation6], 0 }
   0x2   :  { %13 = vsyncpa [#allocation4], 0 }
   0x3   :  { %14 = vsyncpa [#allocation9], 0  ;;  %s348_s18 = smov [#allocation2]  }
   0x4   :  { %s20_s19 = sshll.u32 %s348_s18, 4  ;;  %s21_s19 = int_to_ptr.vmem [resolvable:$true] %s20_s19 }
   0x5   :  { %s248_s20 = scalar_lea.vmem %s21_s19, 256  ;;  %p253_p1 = scmp.lt.s32.totalorder %s21_s19, %s21_s19 }
   0x6   :  { %p249_p0 = scmp.ne.s32.totalorder %s21_s19, %s248_s20  ;;  %p254_p2 = scmp.lt.s32.totalorder %s248_s20, %s248_s20 }
   0x8   :  { %p255_p3 = por %p254_p2, %p253_p1 }
   0xa   :  { %p256_p4 = pnand %p255_p3, %p249_p0 }
   0xc   :  { %259 = shalt.err (!%p256_p4)
}
   0xd   :  { %s349_s21 = smov 128   ;;  %s350_s22 = smov 8  }
   0xe   :  { %26 = dma.hbm_to_vmem [thread:$0]  %s428_s0, 256, %s21_s19, [#allocation3], %s349_s21, %s349_s21, %s350_s22  }
   0xf   :  { %s351_s25 = smov [#allocation5]  }
  0x10   :  { %s32_s26 = sshll.u32 %s351_s25, 4  ;;  %s33_s26 = int_to_ptr.vmem [resolvable:$true] %s32_s26 }
  0x11   :  { %s268_s27 = scalar_lea.vmem %s33_s26, 512  ;;  %p273_p6 = scmp.lt.s32.totalorder %s33_s26, %s33_s26 }
  0x12   :  { %p269_p5 = scmp.ne.s32.totalorder %s33_s26, %s268_s27  ;;  %p274_p7 = scmp.lt.s32.totalorder %s268_s27, %s268_s27 }
  0x14   :  { %p275_p8 = por %p274_p7, %p273_p6 }
  0x16   :  { %p276_p9 = pnand %p275_p8, %p269_p5 }
  0x18   :  { %279 = shalt.err (!%p276_p9)
}
  0x19   :  { %38 = dma.hbm_to_vmem [thread:$0]  %s429_s1, 512, %s33_s26, [#allocation6], %s349_s21, %s349_s21, %s350_s22  }
  0x1a   :  { %340 = dma.done.wait [#allocation3], 256  }
  0x1b   :  { %341 = vsyncadd [#allocation3], 4294967040 }
  0x1c   :  { %342 = dma.done.wait [#allocation6], 512  }
  0x1d   :  { %343 = vsyncadd [#allocation6], 4294966784  ;;  %vm60_vm0 = vcmask 261120   ;;  %v52_v0 = vld [vmem:[#allocation5 + $0x18] sm:$0xff]  ;;  %v51_v1 = vld [vmem:[#allocation5 + $0x10] sm:$0xff]  ;;  %s352_s30 = smov [#allocation7]  }
  0x1e   :  { %220 = vmatprep.subr.mxu0 %v52_v0  ;;  %v47_v2 = vld [vmem:[#allocation2] sm:$0xff]  ;;  %v50_v3 = vld [vmem:[#allocation5 + $0x8] sm:$0xff]  ;;  %v49_v4 = vld [vmem:[#allocation5] sm:$0xff]  ;;  %s167_s6 = sshll.u32 %s352_s30, 4  ;;  %s353_s7 = smov 64   ;;  %s168_s6 = int_to_ptr.vmem [resolvable:$true] %s167_s6 }
  0x1f   :  { %221 = vmatpush3.msra.mxu0 %v52_v0  ;;  %228 = vmatprep.mubr.msk.f32.mxu0 %vm60_vm0, %v47_v2  ;;  %v48_v5 = vld [vmem:[#allocation2 + $0x8] sm:$0xff]  ;;  %v211_v6 = vld [vmem:[%s430_s2] ss:$0 sm:$0xff]  ;;  %s354_s8 = smov 96   ;;  %s280_s9 = scalar_lea.vmem %s168_s6, 256 }
  0x20   :  { %222 = vmatprep.subr.mxu0 %v51_v1  ;;  %p281_p10 = scmp.ne.s32.totalorder %s168_s6, %s280_s9  ;;  %p285_p11 = scmp.lt.s32.totalorder %s168_s6, %s168_s6 }
  0x21   :  { %223 = vmatpush3.msra.mxu0 %v51_v1  ;;  %p286_p12 = scmp.lt.s32.totalorder %s280_s9, %s280_s9 }
  0x22   :  { %224 = vmatprep.subr.mxu0 %v50_v3 }
  0x23   :  { %225 = vmatpush3.msra.mxu0 %v50_v3  ;;  %p287_p13 = por %p286_p12, %p285_p11 }
  0x24   :  { %226 = vmatprep.subr.mxu0 %v49_v4 }
  0x25   :  { %227 = vmatpush3.msra.mxu0 %v49_v4  ;;  %p288_p0 = pnand %p287_p13, %p281_p10 }
  0x26   :  { %229 = vmatmul.mubr.msk.f32.vlgmr.msra.gmra.mxu0 %vm60_vm0, %v48_v5 }
  0xe6   :  { %v230_v7 = vpop.f32.mrf.mxu0 }
  0xe7   :  { %v139_v8 = vadd.f32 %v230_v7, %v211_v6 }
  0xe8   :  { %v133_v9 = vpop.f32.mrf.mxu0 }
  0xe9   :  { %143 = vst.msk [vmem:[#allocation7 + $0x8] sm:$0xff] %vm60_vm0, %v139_v8  ;;  %v134_v10 = vadd.f32 %v211_v6, %v133_v9 }
  0xeb   :  { %142 = vst.msk [vmem:[#allocation7] sm:$0xff] %vm60_vm0, %v134_v10  ;;  %154 = vrot.lane.b32.xlu1 %v134_v10, %s353_s7  ;;  %146 = vrot.lane.b32.xlu0 %v134_v10, %s354_s8 }
  0xec   :  { %291 = shalt.err (!%p288_p0)
}
  0xed   :  { %173 = dma.vmem_to_hbm [thread:$0]  %s168_s6, 256, %s431_s3, [#allocation4], %s349_s21, %s349_s21, %s350_s22  }
  0xee   :  { %s355_s11 = smov [#allocation8]   ;;  %s356_s13 = smov [#allocation10]  }
  0xef   :  { %156 = vrot.lane.b32.xlu1 %v139_v8, %s353_s7  ;;  %148 = vrot.lane.b32.xlu0 %v139_v8, %s354_s8  ;;  %s179_s12 = sshll.u32 %s355_s11, 4  ;;  %s191_s14 = sshll.u32 %s356_s13, 4  ;;  %s180_s12 = int_to_ptr.vmem [resolvable:$true] %s179_s12  ;;  %s192_s14 = int_to_ptr.vmem [resolvable:$true] %s191_s14 }
  0xf0   :  { %s300_s3 = scalar_lea.vmem %s180_s12, 256  ;;  %p305_p2 = scmp.lt.s32.totalorder %s180_s12, %s180_s12 }
  0xf1   :  { %p301_p1 = scmp.ne.s32.totalorder %s180_s12, %s300_s3  ;;  %p306_p3 = scmp.lt.s32.totalorder %s300_s3, %s300_s3 }
  0xf3   :  { %p307_p4 = por %p306_p3, %p305_p2 }
  0xf5   :  { %p308_p5 = pnand %p307_p4, %p301_p1 }
 0x15d   :  { %v155_v11 = vpop.permute.xlu1 %154  ;;  %v147_v12 = vpop.permute.xlu0 %146 }
 0x15e   :  { %160 = vst.msk [vmem:[#allocation10] sm:$0xff] %vm60_vm0, %v155_v11  ;;  %152 = vst.msk [vmem:[#allocation8] sm:$0xff] %vm60_vm0, %v147_v12 }
 0x161   :  { %v157_v13 = vpop.permute.xlu1 %156  ;;  %v149_v14 = vpop.permute.xlu0 %148 }
 0x162   :  { %161 = vst.msk [vmem:[#allocation10 + $0x8] sm:$0xff] %vm60_vm0, %v157_v13  ;;  %153 = vst.msk [vmem:[#allocation8 + $0x8] sm:$0xff] %vm60_vm0, %v149_v14 }
 0x163   :  { %311 = shalt.err (!%p308_p5)
}
 0x164   :  { %185 = dma.vmem_to_hbm [thread:$0]  %s180_s12, 256, %s432_s4, [#allocation9], %s349_s21, %s349_s21, %s350_s22  }
 0x165   :  { %s320_s17 = scalar_lea.vmem %s192_s14, 256  ;;  %p325_p7 = scmp.lt.s32.totalorder %s192_s14, %s192_s14 }
 0x166   :  { %p321_p6 = scmp.ne.s32.totalorder %s192_s14, %s320_s17  ;;  %p326_p8 = scmp.lt.s32.totalorder %s320_s17, %s320_s17 }
 0x168   :  { %p327_p9 = por %p326_p8, %p325_p7 }
 0x16a   :  { %p328_p10 = pnand %p327_p9, %p321_p6 }
 0x16c   :  { %331 = shalt.err (!%p328_p10)
}
 0x16d   :  { %197 = dma.vmem_to_hbm [thread:$0]  %s192_s14, 256, %s433_s5, [#allocation9], %s349_s21, %s349_s21, %s350_s22  }
 0x16e   :  { %344 = dma.done.wait [#allocation4], 256  }
 0x16f   :  { %345 = vsyncadd [#allocation4], 4294967040 }
 0x170   :  { %346 = dma.done.wait [#allocation9], 512  }
 0x171   :  { %347 = vsyncadd [#allocation9], 4294966784 }
 0x172   :  { %207 = vsyncpa [#allocation3], 1 }
 0x173   :  { %208 = vsyncpa [#allocation6], 1 }
 0x174   :  { %209 = vsyncpa [#allocation4], 1 }
 0x175   :  { %210 = vsyncpa [#allocation9], 1 }

// kernel: tpu_custom_call.1
= control target key start
LH: loop header
LB: loop body
LE: loop exit
PB: predicated region body
PF: predicated region fallthrough
CT: control target
= control target key end

     0   :  { %11 = vsyncpa [#allocation3], 0  ;;  %s428_s0 = inlined_call_operand.hbm [shape: f32[16,32], index: 0, kind: input, shape index: {}]   ;;  %s429_s1 = inlined_call_operand.hbm [shape: f32[32,96], index: 1, kind: input, shape index: {}]   ;;  %s430_s2 = inlined_call_operand.vmem [shape: f32[1,96], index: 2, kind: input, shape index: {}]   ;;  %s431_s3 = inlined_call_operand.hbm [shape: f32[16,32], index: 3, kind: output, shape index: {0}]   ;;  %s432_s4 = inlined_call_operand.hbm [shape: f32[16,32], index: 4, kind: output, shape index: {1}]   ;;  %s433_s5 = inlined_call_operand.hbm [shape: f32[16,32], index: 5, kind: output, shape index: {2}]  }
   0x1   :  { %12 = vsyncpa [#allocation6], 0 }
   0x2   :  { %13 = vsyncpa [#allocation4], 0 }
   0x3   :  { %14 = vsyncpa [#allocation9], 0  ;;  %s348_s18 = smov [#allocation2]  }
   0x4   :  { %s20_s19 = sshll.u32 %s348_s18, 4  ;;  %s21_s19 = int_to_ptr.vmem [resolvable:$true] %s20_s19 }
   0x5   :  { %s248_s20 = scalar_lea.vmem %s21_s19, 256  ;;  %p253_p1 = scmp.lt.s32.totalorder %s21_s19, %s21_s19 }
   0x6   :  { %p249_p0 = scmp.ne.s32.totalorder %s21_s19, %s248_s20  ;;  %p254_p2 = scmp.lt.s32.totalorder %s248_s20, %s248_s20 }
   0x8   :  { %p255_p3 = por %p254_p2, %p253_p1 }
   0xa   :  { %p256_p4 = pnand %p255_p3, %p249_p0 }
   0xc   :  { %259 = shalt.err (!%p256_p4)
}
   0xd   :  { %s349_s21 = smov 128   ;;  %s350_s22 = smov 8  }
   0xe   :  { %26 = dma.hbm_to_vmem [thread:$0]  %s428_s0, 256, %s21_s19, [#allocation3], %s349_s21, %s349_s21, %s350_s22  }
   0xf   :  { %s351_s25 = smov [#allocation5]  }
  0x10   :  { %s32_s26 = sshll.u32 %s351_s25, 4  ;;  %s33_s26 = int_to_ptr.vmem [resolvable:$true] %s32_s26 }
  0x11   :  { %s268_s27 = scalar_lea.vmem %s33_s26, 512  ;;  %p273_p6 = scmp.lt.s32.totalorder %s33_s26, %s33_s26 }
  0x12   :  { %p269_p5 = scmp.ne.s32.totalorder %s33_s26, %s268_s27  ;;  %p274_p7 = scmp.lt.s32.totalorder %s268_s27, %s268_s27 }
  0x14   :  { %p275_p8 = por %p274_p7, %p273_p6 }
  0x16   :  { %p276_p9 = pnand %p275_p8, %p269_p5 }
  0x18   :  { %279 = shalt.err (!%p276_p9)
}
  0x19   :  { %38 = dma.hbm_to_vmem [thread:$0]  %s429_s1, 512, %s33_s26, [#allocation6], %s349_s21, %s349_s21, %s350_s22  }
  0x1a   :  { %340 = dma.done.wait [#allocation3], 256  }
  0x1b   :  { %341 = vsyncadd [#allocation3], 4294967040 }
  0x1c   :  { %342 = dma.done.wait [#allocation6], 512  }
  0x1d   :  { %343 = vsyncadd [#allocation6], 4294966784  ;;  %vm60_vm0 = vcmask 261120   ;;  %v52_v0 = vld [vmem:[#allocation5 + $0x18] sm:$0xff]  ;;  %v51_v1 = vld [vmem:[#allocation5 + $0x10] sm:$0xff]  ;;  %s352_s30 = smov [#allocation7]  }
  0x1e   :  { %220 = vmatprep.subr.mxu0 %v52_v0  ;;  %v47_v2 = vld [vmem:[#allocation2] sm:$0xff]  ;;  %v50_v3 = vld [vmem:[#allocation5 + $0x8] sm:$0xff]  ;;  %v49_v4 = vld [vmem:[#allocation5] sm:$0xff]  ;;  %s167_s6 = sshll.u32 %s352_s30, 4  ;;  %s353_s7 = smov 64   ;;  %s168_s6 = int_to_ptr.vmem [resolvable:$true] %s167_s6 }
  0x1f   :  { %221 = vmatpush3.msra.mxu0 %v52_v0  ;;  %228 = vmatprep.mubr.msk.f32.mxu0 %vm60_vm0, %v47_v2  ;;  %v48_v5 = vld [vmem:[#allocation2 + $0x8] sm:$0xff]  ;;  %v211_v6 = vld [vmem:[%s430_s2] ss:$0 sm:$0xff]  ;;  %s354_s8 = smov 96   ;;  %s280_s9 = scalar_lea.vmem %s168_s6, 256 }
  0x20   :  { %222 = vmatprep.subr.mxu0 %v51_v1  ;;  %p281_p10 = scmp.ne.s32.totalorder %s168_s6, %s280_s9  ;;  %p285_p11 = scmp.lt.s32.totalorder %s168_s6, %s168_s6 }
  0x21   :  { %223 = vmatpush3.msra.mxu0 %v51_v1  ;;  %p286_p12 = scmp.lt.s32.totalorder %s280_s9, %s280_s9 }
  0x22   :  { %224 = vmatprep.subr.mxu0 %v50_v3 }
  0x23   :  { %225 = vmatpush3.msra.mxu0 %v50_v3  ;;  %p287_p13 = por %p286_p12, %p285_p11 }
  0x24   :  { %226 = vmatprep.subr.mxu0 %v49_v4 }
  0x25   :  { %227 = vmatpush3.msra.mxu0 %v49_v4  ;;  %p288_p0 = pnand %p287_p13, %p281_p10 }
  0x26   :  { %229 = vmatmul.mubr.msk.f32.vlgmr.msra.gmra.mxu0 %vm60_vm0, %v48_v5 }
  0xe6   :  { %v230_v7 = vpop.f32.mrf.mxu0 }
  0xe7   :  { %v139_v8 = vadd.f32 %v230_v7, %v211_v6 }
  0xe8   :  { %v133_v9 = vpop.f32.mrf.mxu0 }
  0xe9   :  { %143 = vst.msk [vmem:[#allocation7 + $0x8] sm:$0xff] %vm60_vm0, %v139_v8  ;;  %v134_v10 = vadd.f32 %v211_v6, %v133_v9 }
  0xeb   :  { %142 = vst.msk [vmem:[#allocation7] sm:$0xff] %vm60_vm0, %v134_v10  ;;  %154 = vrot.lane.b32.xlu1 %v134_v10, %s353_s7  ;;  %146 = vrot.lane.b32.xlu0 %v134_v10, %s354_s8 }
  0xec   :  { %291 = shalt.err (!%p288_p0)
}
  0xed   :  { %173 = dma.vmem_to_hbm [thread:$0]  %s168_s6, 256, %s431_s3, [#allocation4], %s349_s21, %s349_s21, %s350_s22  }
  0xee   :  { %s355_s11 = smov [#allocation8]   ;;  %s356_s13 = smov [#allocation10]  }
  0xef   :  { %156 = vrot.lane.b32.xlu1 %v139_v8, %s353_s7  ;;  %148 = vrot.lane.b32.xlu0 %v139_v8, %s354_s8  ;;  %s179_s12 = sshll.u32 %s355_s11, 4  ;;  %s191_s14 = sshll.u32 %s356_s13, 4  ;;  %s180_s12 = int_to_ptr.vmem [resolvable:$true] %s179_s12  ;;  %s192_s14 = int_to_ptr.vmem [resolvable:$true] %s191_s14 }
  0xf0   :  { %s300_s3 = scalar_lea.vmem %s180_s12, 256  ;;  %p305_p2 = scmp.lt.s32.totalorder %s180_s12, %s180_s12 }
  0xf1   :  { %p301_p1 = scmp.ne.s32.totalorder %s180_s12, %s300_s3  ;;  %p306_p3 = scmp.lt.s32.totalorder %s300_s3, %s300_s3 }
  0xf3   :  { %p307_p4 = por %p306_p3, %p305_p2 }
  0xf5   :  { %p308_p5 = pnand %p307_p4, %p301_p1 }
 0x15d   :  { %v155_v11 = vpop.permute.xlu1 %154  ;;  %v147_v12 = vpop.permute.xlu0 %146 }
 0x15e   :  { %160 = vst.msk [vmem:[#allocation10] sm:$0xff] %vm60_vm0, %v155_v11  ;;  %152 = vst.msk [vmem:[#allocation8] sm:$0xff] %vm60_vm0, %v147_v12 }
 0x161   :  { %v157_v13 = vpop.permute.xlu1 %156  ;;  %v149_v14 = vpop.permute.xlu0 %148 }
 0x162   :  { %161 = vst.msk [vmem:[#allocation10 + $0x8] sm:$0xff] %vm60_vm0, %v157_v13  ;;  %153 = vst.msk [vmem:[#allocation8 + $0x8] sm:$0xff] %vm60_vm0, %v149_v14 }
 0x163   :  { %311 = shalt.err (!%p308_p5)
}
 0x164   :  { %185 = dma.vmem_to_hbm [thread:$0]  %s180_s12, 256, %s432_s4, [#allocation9], %s349_s21, %s349_s21, %s350_s22  }
 0x165   :  { %s320_s17 = scalar_lea.vmem %s192_s14, 256  ;;  %p325_p7 = scmp.lt.s32.totalorder %s192_s14, %s192_s14 }
 0x166   :  { %p321_p6 = scmp.ne.s32.totalorder %s192_s14, %s320_s17  ;;  %p326_p8 = scmp.lt.s32.totalorder %s320_s17, %s320_s17 }
 0x168   :  { %p327_p9 = por %p326_p8, %p325_p7 }
 0x16a   :  { %p328_p10 = pnand %p327_p9, %p321_p6 }
 0x16c   :  { %331 = shalt.err (!%p328_p10)
}
 0x16d   :  { %197 = dma.vmem_to_hbm [thread:$0]  %s192_s14, 256, %s433_s5, [#allocation9], %s349_s21, %s349_s21, %s350_s22  }
 0x16e   :  { %344 = dma.done.wait [#allocation4], 256  }
 0x16f   :  { %345 = vsyncadd [#allocation4], 4294967040 }
 0x170   :  { %346 = dma.done.wait [#allocation9], 512  }
 0x171   :  { %347 = vsyncadd [#allocation9], 4294966784 }
 0x172   :  { %207 = vsyncpa [#allocation3], 1 }
 0x173   :  { %208 = vsyncpa [#allocation6], 1 }
 0x174   :  { %209 = vsyncpa [#allocation4], 1 }
 0x175   :  { %210 = vsyncpa [#allocation9], 1 }

</bundles_post_ra>
